<compile_context>
chip_gen: v6e
topology: v6e:2x2x1
jax: 0.10.0
libtpu: 0.0.40
codegen_flags: <defaults>
</compile_context>

<pallas_src>
import jax
import jax.numpy as jnp
from jax.experimental import pallas as pl
from jax.experimental.pallas import tpu as pltpu

# ----- small, module-consistent shapes -----
B = 4           # logical batch
BP = 8          # batch padded to one full sublane tile (8 rows)
T = 8           # sequence length
WE = 22         # word_embed_size (ctor arg)
PE = 10         # pos_embed_size  (fixed in BaseModel)
D = WE + PE     # 32 : GRU input size
H = 32          # rnn_dim (num_directions = 1, num_layers = 1)
G3 = 3 * H      # packed gate width [ r | z | n ]
Y = 16          # number of labels
VOCAB = 50      # len(dicts[0]); embedding table has VOCAB + 2 rows
POS_SIZE = 24


def gru_rnn_kernel(ew_ref, ep_ref, wihw_ref, wihp_ref, whh_ref, bgi_ref, bgh_ref,
                   wf_ref, bf_ref, tgt_ref, msk_ref,
                   yhat_ref, loss_ref):
    # --- hoisted input projection for every timestep at once (off the recurrent chain) ---
    # bf16 operands, f32 accumulation: (T*BP, WE)@(WE,3H) + (T*BP, PE)@(PE,3H) + folded biases.
    gi_all = (jnp.dot(ew_ref[...], wihw_ref[...], preferred_element_type=jnp.float32)
              + jnp.dot(ep_ref[...], wihp_ref[...], preferred_element_type=jnp.float32)
              + bgi_ref[...])                              # (T*BP, 3H) f32, gates [r|z|n]

    whh = whh_ref[...]                                     # (H, 3H) bf16, pre-transposed/packed
    # Hoisted full-width recurrent-path bias [0 | 0 | b_hh_n]; single broadcast for all steps.
    bgh = jnp.broadcast_to(bgh_ref[...], (BP, G3))         # (BP, 3H) f32

    h = jnp.zeros((BP, H), jnp.float32)

    # Fully-unrolled time loop (T = 8). Only (bf16 h)@(bf16 W_hh) + gate nonlinearities remain
    # on the serial dependence chain of each step; all slices are sublane-tile aligned (8 rows).
    for t in range(T):
        gi = gi_all[t * BP:(t + 1) * BP, :]                                 # (BP, 3H)
        gh = jnp.dot(h.astype(jnp.bfloat16), whh,
                     preferred_element_type=jnp.float32)                    # (BP, 3H)
        ghb = gh + bgh                                     # adds b_hh_n to n-columns only
        s = gi + ghb                                       # one full-width add; r/z read from s
        r = jax.nn.sigmoid(s[:, 0:H])
        z = jax.nn.sigmoid(s[:, H:2 * H])
        n = jnp.tanh(gi[:, 2 * H:G3] + r * ghb[:, 2 * H:G3])
        h = (1.0 - z) * n + z * h

    # --- epilogue: final linear + sigmoid, then the loss (padded rows masked) ---
    logits = jnp.dot(h, wf_ref[...], preferred_element_type=jnp.float32) + bf_ref[...]
    yhat = jax.nn.sigmoid(logits)                          # (BP, Y)
    yhat_ref[...] = yhat.astype(yhat_ref.dtype)

    # BCE-with-logits applied to yhat (matches the original code's double-sigmoid behavior).
    tgt = tgt_ref[...]
    xv = yhat
    elem = jnp.maximum(xv, 0.0) - xv * tgt + jnp.log1p(jnp.exp(-jnp.abs(xv)))
    elem = elem * msk_ref[...]                             # zero out padded batch rows
    loss2d = jnp.sum(elem, axis=0, keepdims=True)          # (1, Y)
    loss2d = jnp.sum(loss2d, axis=1, keepdims=True)        # (1, 1)
    loss_ref[...] = loss2d * (1.0 / float(B * Y))


def pack_params(emb_word_tbl, emb_pos_tbl, w_ih, w_hh, b_ih, b_hh, w_final, b_final):
    """One-time weight repacking; keep this OUT of the per-call jitted path."""
    wih_t = jnp.concatenate([w_ih[0].T, w_ih[1].T, w_ih[2].T], axis=1)           # (D, 3H)
    wihw = wih_t[:WE].astype(jnp.bfloat16)                                        # (WE, 3H)
    wihp = wih_t[WE:].astype(jnp.bfloat16)                                        # (PE, 3H)
    whh_t = jnp.concatenate([w_hh[0].T, w_hh[1].T, w_hh[2].T],
                            axis=1).astype(jnp.bfloat16)                          # (H, 3H)
    # Folded biases: r/z get (b_ih + b_hh); n gets only b_ih (b_hh_n is scaled by r).
    b_gi = jnp.concatenate([b_ih[0] + b_hh[0], b_ih[1] + b_hh[1], b_ih[2]], axis=1)  # (1, 3H)
    b_gh = jnp.concatenate([jnp.zeros((1, H), jnp.float32),
                            jnp.zeros((1, H), jnp.float32), b_hh[2]], axis=1)        # (1, 3H)
    wf_t = w_final.T                                                                  # (H, Y)
    mask = (jnp.arange(BP) < B).astype(jnp.float32).reshape(BP, 1)                    # (BP, 1)
    return dict(emb_word=emb_word_tbl, emb_pos=emb_pos_tbl,
                wihw=wihw, wihp=wihp, whh=whh_t, b_gi=b_gi, b_gh=b_gh,
                wf=wf_t, bf=b_final, mask=mask)


def vanilla_rnn_forward(x_word, x_pos, target, params):
    """x_word/x_pos: (B, T) int ids; target: (B, Y) f32; params: output of pack_params.
    Returns (yhat (B, Y), loss scalar)."""
    # Pad batch with token id 0 (padding_idx -> zero embedding rows for padded sequences).
    xw = jnp.zeros((BP, T), x_word.dtype).at[:B, :].set(x_word)
    xp = jnp.zeros((BP, T), x_pos.dtype).at[:B, :].set(x_pos)
    # Gather with transposed indices -> time-major (T, BP, *) directly; no transpose/concat
    # materializations of the embedding tensor on the launch path.
    e_w = jnp.take(params["emb_word"], xw.T, axis=0).reshape(T * BP, WE).astype(jnp.bfloat16)
    e_p = jnp.take(params["emb_pos"], xp.T, axis=0).reshape(T * BP, PE).astype(jnp.bfloat16)
    tgt_p = jnp.zeros((BP, Y), jnp.float32).at[:B, :].set(target)

    flops = 2 * T * BP * D * G3 + 2 * T * BP * H * G3 + 2 * BP * H * Y
    transcendentals = 3 * T * BP * H + 2 * BP * Y
    bytes_accessed = (e_w.size * 2 + e_p.size * 2
                      + params["wihw"].size * 2 + params["wihp"].size * 2
                      + params["whh"].size * 2
                      + params["b_gi"].size * 4 + params["b_gh"].size * 4
                      + params["wf"].size * 4 + params["bf"].size * 4
                      + tgt_p.size * 4 + params["mask"].size * 4
                      + BP * Y * 4 + 4)

    vmem = pltpu.MemorySpace.VMEM
    yhat_p, loss = pl.pallas_call(
        gru_rnn_kernel,
        out_shape=(jax.ShapeDtypeStruct((BP, Y), jnp.float32),
                   jax.ShapeDtypeStruct((1, 1), jnp.float32)),
        in_specs=[pl.BlockSpec(memory_space=vmem)] * 11,
        out_specs=(pl.BlockSpec(memory_space=vmem),
                   pl.BlockSpec(memory_space=vmem)),
        cost_estimate=pl.CostEstimate(flops=flops, transcendentals=transcendentals,
                                      bytes_accessed=bytes_accessed),
    )(e_w, e_p, params["wihw"], params["wihp"], params["whh"],
      params["b_gi"], params["b_gh"], params["wf"], params["bf"],
      tgt_p, params["mask"])
    return yhat_p[:B], loss[0, 0]


def reference_forward(x_word, x_pos, target, emb_word_tbl, emb_pos_tbl,
                      w_ih, w_hh, b_ih, b_hh, w_final, b_final):
    """Plain-JAX f32 reference (unpacked weights, per-gate matmuls) for validation."""
    e_w = jnp.take(emb_word_tbl, x_word, axis=0)                     # (B, T, WE)
    e_p = jnp.take(emb_pos_tbl, x_pos, axis=0)                       # (B, T, PE)
    embeds = jnp.concatenate([e_w, e_p], axis=-1).transpose(1, 0, 2) # (T, B, D)
    h = jnp.zeros((B, H), jnp.float32)
    for t in range(T):
        x = embeds[t]
        gi_r = x @ w_ih[0].T + b_ih[0]
        gi_z = x @ w_ih[1].T + b_ih[1]
        gi_n = x @ w_ih[2].T + b_ih[2]
        gh_r = h @ w_hh[0].T + b_hh[0]
        gh_z = h @ w_hh[1].T + b_hh[1]
        gh_n = h @ w_hh[2].T + b_hh[2]
        r = jax.nn.sigmoid(gi_r + gh_r)
        z = jax.nn.sigmoid(gi_z + gh_z)
        n = jnp.tanh(gi_n + r * gh_n)
        h = (1.0 - z) * n + z * h
    yhat = jax.nn.sigmoid(h @ w_final.T + b_final)
    xv = yhat
    elem = jnp.maximum(xv, 0.0) - xv * target + jnp.log1p(jnp.exp(-jnp.abs(xv)))
    return yhat, jnp.mean(elem)


if __name__ == "__main__":
    key = jax.random.PRNGKey(0)
    keys = jax.random.split(key, 12)

    # ---- deterministic "parameters" (synthetic, not a checkpoint) ----
    emb_word_tbl = 0.1 * jax.random.normal(keys[0], (VOCAB + 2, WE), jnp.float32)
    emb_word_tbl = emb_word_tbl.at[0].set(0.0)                      # padding_idx = 0
    emb_pos_tbl = 0.1 * jax.random.normal(keys[1], (POS_SIZE, PE), jnp.float32)
    emb_pos_tbl = emb_pos_tbl.at[0].set(0.0)                        # padding_idx = 0

    w_ih = 0.1 * jax.random.normal(keys[2], (3, H, D), jnp.float32)   # gates [r, z, n]
    w_hh = 0.1 * jax.random.normal(keys[3], (3, H, H), jnp.float32)
    b_ih = 0.1 * jax.random.normal(keys[4], (3, 1, H), jnp.float32)
    b_hh = 0.1 * jax.random.normal(keys[5], (3, 1, H), jnp.float32)
    w_final = 0.1 * jax.random.normal(keys[6], (Y, H), jnp.float32)
    b_final = 0.1 * jax.random.normal(keys[7], (1, Y), jnp.float32)

    # ---- example inputs ----
    x_word = jax.random.randint(keys[8], (B, T), 1, VOCAB + 2)       # (B, T) token ids
    x_pos = jax.random.randint(keys[9], (B, T), 1, POS_SIZE)         # (B, T) POS ids
    target = jax.random.bernoulli(keys[10], 0.3, (B, Y)).astype(jnp.float32)

    # One-time weight repacking outside the per-call jitted path.
    params = pack_params(emb_word_tbl, emb_pos_tbl, w_ih, w_hh, b_ih, b_hh, w_final, b_final)

    fwd = jax.jit(vanilla_rnn_forward)
    yhat, loss = fwd(x_word, x_pos, target, params)
    jax.block_until_ready((yhat, loss))

    yhat_ref, loss_ref = reference_forward(
        x_word, x_pos, target, emb_word_tbl, emb_pos_tbl,
        w_ih, w_hh, b_ih, b_hh, w_final, b_final)

    assert yhat.shape == (B, Y)
    # bf16 MXU operands with f32 accumulation vs. the f32 reference: slightly relaxed tolerance.
    assert jnp.allclose(yhat, yhat_ref, atol=2e-3, rtol=2e-3)
    assert jnp.allclose(loss, loss_ref, atol=2e-3, rtol=2e-3)

    print("KERNEL_OK")
</pallas_src>

<mosaic_0001>
module attributes {stable_mosaic.version = 11 : i64} {
  func.func @gru_rnn_kernel(%arg0: memref<64x22xbf16, #tpu.memory_space<vmem>>, %arg1: memref<64x10xbf16, #tpu.memory_space<vmem>>, %arg2: memref<22x96xbf16, #tpu.memory_space<vmem>>, %arg3: memref<10x96xbf16, #tpu.memory_space<vmem>>, %arg4: memref<32x96xbf16, #tpu.memory_space<vmem>>, %arg5: memref<1x96xf32, #tpu.memory_space<vmem>>, %arg6: memref<1x96xf32, #tpu.memory_space<vmem>>, %arg7: memref<32x16xf32, #tpu.memory_space<vmem>>, %arg8: memref<1x16xf32, #tpu.memory_space<vmem>>, %arg9: memref<8x16xf32, #tpu.memory_space<vmem>>, %arg10: memref<8x1xf32, #tpu.memory_space<vmem>>, %arg11: memref<8x16xf32, #tpu.memory_space<vmem>>, %arg12: memref<1x1xf32, #tpu.memory_space<vmem>>) attributes {dimension_semantics = [], scalar_prefetch = 0 : i64, scratch_operands = 0 : i64, tpu.core_type = #tpu.core_type<tc>} {
    %c0 = arith.constant 0 : index
    %c0_0 = arith.constant 0 : index
    %0 = vector.load %arg0[%c0, %c0_0] : memref<64x22xbf16, #tpu.memory_space<vmem>>, vector<64x22xbf16>
    %c0_1 = arith.constant 0 : index
    %c0_2 = arith.constant 0 : index
    %1 = vector.load %arg2[%c0_1, %c0_2] : memref<22x96xbf16, #tpu.memory_space<vmem>>, vector<22x96xbf16>
    %cst = arith.constant dense<0.000000e+00> : vector<64x96xf32>
    %2 = tpu.matmul %0, %1, %cst {dimension_numbers = #tpu.dot_dimension_numbers<[1], [0], [0], [1], [0, 0, 1, 1], [], []>} : vector<64x22xbf16>, vector<22x96xbf16>, vector<64x96xf32> -> vector<64x96xf32>
    %c0_3 = arith.constant 0 : index
    %c0_4 = arith.constant 0 : index
    %3 = vector.load %arg1[%c0_3, %c0_4] : memref<64x10xbf16, #tpu.memory_space<vmem>>, vector<64x10xbf16>
    %c0_5 = arith.constant 0 : index
    %c0_6 = arith.constant 0 : index
    %4 = vector.load %arg3[%c0_5, %c0_6] : memref<10x96xbf16, #tpu.memory_space<vmem>>, vector<10x96xbf16>
    %cst_7 = arith.constant dense<0.000000e+00> : vector<64x96xf32>
    %5 = tpu.matmul %3, %4, %cst_7 {dimension_numbers = #tpu.dot_dimension_numbers<[1], [0], [0], [1], [0, 0, 1, 1], [], []>} : vector<64x10xbf16>, vector<10x96xbf16>, vector<64x96xf32> -> vector<64x96xf32>
    %6 = arith.addf %2, %5 : vector<64x96xf32>
    %c0_8 = arith.constant 0 : index
    %c0_9 = arith.constant 0 : index
    %7 = vector.load %arg5[%c0_8, %c0_9] : memref<1x96xf32, #tpu.memory_space<vmem>>, vector<1x96xf32>
    %8 = vector.broadcast %7 : vector<1x96xf32> to vector<64x96xf32>
    %9 = arith.addf %6, %8 : vector<64x96xf32>
    %c0_10 = arith.constant 0 : index
    %c0_11 = arith.constant 0 : index
    %10 = vector.load %arg4[%c0_10, %c0_11] : memref<32x96xbf16, #tpu.memory_space<vmem>>, vector<32x96xbf16>
    %c0_12 = arith.constant 0 : index
    %c0_13 = arith.constant 0 : index
    %11 = vector.load %arg6[%c0_12, %c0_13] : memref<1x96xf32, #tpu.memory_space<vmem>>, vector<1x96xf32>
    %12 = vector.shape_cast %11 : vector<1x96xf32> to vector<1x96xf32>
    %13 = vector.broadcast %12 : vector<1x96xf32> to vector<8x96xf32>
    %cst_14 = arith.constant 0.000000e+00 : f32
    %14 = vector.broadcast %cst_14 : f32 to vector<8x32xf32>
    %15 = vector.extract_strided_slice %9 {offsets = [0, 0], sizes = [8, 96], strides = [1, 1]} : vector<64x96xf32> to vector<8x96xf32>
    %16 = arith.truncf %14 : vector<8x32xf32> to vector<8x32xbf16>
    %cst_15 = arith.constant dense<0.000000e+00> : vector<8x96xf32>
    %17 = tpu.matmul %16, %10, %cst_15 {dimension_numbers = #tpu.dot_dimension_numbers<[1], [0], [0], [1], [0, 0, 1, 1], [], []>} : vector<8x32xbf16>, vector<32x96xbf16>, vector<8x96xf32> -> vector<8x96xf32>
    %18 = arith.addf %17, %13 : vector<8x96xf32>
    %19 = arith.addf %15, %18 : vector<8x96xf32>
    %20 = vector.extract_strided_slice %19 {offsets = [0, 0], sizes = [8, 32], strides = [1, 1]} : vector<8x96xf32> to vector<8x32xf32>
    %21 = arith.negf %20 : vector<8x32xf32>
    %22 = math.exp %21 : vector<8x32xf32>
    %cst_16 = arith.constant 1.000000e+00 : f32
    %23 = vector.broadcast %cst_16 : f32 to vector<8x32xf32>
    %24 = arith.addf %23, %22 : vector<8x32xf32>
    %25 = arith.divf %23, %24 : vector<8x32xf32>
    %26 = vector.extract_strided_slice %19 {offsets = [0, 32], sizes = [8, 32], strides = [1, 1]} : vector<8x96xf32> to vector<8x32xf32>
    %27 = arith.negf %26 : vector<8x32xf32>
    %28 = math.exp %27 : vector<8x32xf32>
    %cst_17 = arith.constant 1.000000e+00 : f32
    %29 = vector.broadcast %cst_17 : f32 to vector<8x32xf32>
    %30 = arith.addf %29, %28 : vector<8x32xf32>
    %31 = arith.divf %29, %30 : vector<8x32xf32>
    %32 = vector.extract_strided_slice %15 {offsets = [0, 64], sizes = [8, 32], strides = [1, 1]} : vector<8x96xf32> to vector<8x32xf32>
    %33 = vector.extract_strided_slice %18 {offsets = [0, 64], sizes = [8, 32], strides = [1, 1]} : vector<8x96xf32> to vector<8x32xf32>
    %34 = arith.mulf %25, %33 : vector<8x32xf32>
    %35 = arith.addf %32, %34 : vector<8x32xf32>
    %36 = math.tanh %35 : vector<8x32xf32>
    %cst_18 = arith.constant 1.000000e+00 : f32
    %37 = vector.broadcast %cst_18 : f32 to vector<8x32xf32>
    %38 = arith.subf %37, %31 : vector<8x32xf32>
    %39 = arith.mulf %38, %36 : vector<8x32xf32>
    %40 = arith.mulf %31, %14 : vector<8x32xf32>
    %41 = arith.addf %39, %40 : vector<8x32xf32>
    %42 = vector.extract_strided_slice %9 {offsets = [8, 0], sizes = [8, 96], strides = [1, 1]} : vector<64x96xf32> to vector<8x96xf32>
    %43 = arith.truncf %41 : vector<8x32xf32> to vector<8x32xbf16>
    %cst_19 = arith.constant dense<0.000000e+00> : vector<8x96xf32>
    %44 = tpu.matmul %43, %10, %cst_19 {dimension_numbers = #tpu.dot_dimension_numbers<[1], [0], [0], [1], [0, 0, 1, 1], [], []>} : vector<8x32xbf16>, vector<32x96xbf16>, vector<8x96xf32> -> vector<8x96xf32>
    %45 = arith.addf %44, %13 : vector<8x96xf32>
    %46 = arith.addf %42, %45 : vector<8x96xf32>
    %47 = vector.extract_strided_slice %46 {offsets = [0, 0], sizes = [8, 32], strides = [1, 1]} : vector<8x96xf32> to vector<8x32xf32>
    %48 = arith.negf %47 : vector<8x32xf32>
    %49 = math.exp %48 : vector<8x32xf32>
    %cst_20 = arith.constant 1.000000e+00 : f32
    %50 = vector.broadcast %cst_20 : f32 to vector<8x32xf32>
    %51 = arith.addf %50, %49 : vector<8x32xf32>
    %52 = arith.divf %50, %51 : vector<8x32xf32>
    %53 = vector.extract_strided_slice %46 {offsets = [0, 32], sizes = [8, 32], strides = [1, 1]} : vector<8x96xf32> to vector<8x32xf32>
    %54 = arith.negf %53 : vector<8x32xf32>
    %55 = math.exp %54 : vector<8x32xf32>
    %cst_21 = arith.constant 1.000000e+00 : f32
    %56 = vector.broadcast %cst_21 : f32 to vector<8x32xf32>
    %57 = arith.addf %56, %55 : vector<8x32xf32>
    %58 = arith.divf %56, %57 : vector<8x32xf32>
    %59 = vector.extract_strided_slice %42 {offsets = [0, 64], sizes = [8, 32], strides = [1, 1]} : vector<8x96xf32> to vector<8x32xf32>
    %60 = vector.extract_strided_slice %45 {offsets = [0, 64], sizes = [8, 32], strides = [1, 1]} : vector<8x96xf32> to vector<8x32xf32>
    %61 = arith.mulf %52, %60 : vector<8x32xf32>
    %62 = arith.addf %59, %61 : vector<8x32xf32>
    %63 = math.tanh %62 : vector<8x32xf32>
    %cst_22 = arith.constant 1.000000e+00 : f32
    %64 = vector.broadcast %cst_22 : f32 to vector<8x32xf32>
    %65 = arith.subf %64, %58 : vector<8x32xf32>
    %66 = arith.mulf %65, %63 : vector<8x32xf32>
    %67 = arith.mulf %58, %41 : vector<8x32xf32>
    %68 = arith.addf %66, %67 : vector<8x32xf32>
    %69 = vector.extract_strided_slice %9 {offsets = [16, 0], sizes = [8, 96], strides = [1, 1]} : vector<64x96xf32> to vector<8x96xf32>
    %70 = arith.truncf %68 : vector<8x32xf32> to vector<8x32xbf16>
    %cst_23 = arith.constant dense<0.000000e+00> : vector<8x96xf32>
    %71 = tpu.matmul %70, %10, %cst_23 {dimension_numbers = #tpu.dot_dimension_numbers<[1], [0], [0], [1], [0, 0, 1, 1], [], []>} : vector<8x32xbf16>, vector<32x96xbf16>, vector<8x96xf32> -> vector<8x96xf32>
    %72 = arith.addf %71, %13 : vector<8x96xf32>
    %73 = arith.addf %69, %72 : vector<8x96xf32>
    %74 = vector.extract_strided_slice %73 {offsets = [0, 0], sizes = [8, 32], strides = [1, 1]} : vector<8x96xf32> to vector<8x32xf32>
    %75 = arith.negf %74 : vector<8x32xf32>
    %76 = math.exp %75 : vector<8x32xf32>
    %cst_24 = arith.constant 1.000000e+00 : f32
    %77 = vector.broadcast %cst_24 : f32 to vector<8x32xf32>
    %78 = arith.addf %77, %76 : vector<8x32xf32>
    %79 = arith.divf %77, %78 : vector<8x32xf32>
    %80 = vector.extract_strided_slice %73 {offsets = [0, 32], sizes = [8, 32], strides = [1, 1]} : vector<8x96xf32> to vector<8x32xf32>
    %81 = arith.negf %80 : vector<8x32xf32>
    %82 = math.exp %81 : vector<8x32xf32>
    %cst_25 = arith.constant 1.000000e+00 : f32
    %83 = vector.broadcast %cst_25 : f32 to vector<8x32xf32>
    %84 = arith.addf %83, %82 : vector<8x32xf32>
    %85 = arith.divf %83, %84 : vector<8x32xf32>
    %86 = vector.extract_strided_slice %69 {offsets = [0, 64], sizes = [8, 32], strides = [1, 1]} : vector<8x96xf32> to vector<8x32xf32>
    %87 = vector.extract_strided_slice %72 {offsets = [0, 64], sizes = [8, 32], strides = [1, 1]} : vector<8x96xf32> to vector<8x32xf32>
    %88 = arith.mulf %79, %87 : vector<8x32xf32>
    %89 = arith.addf %86, %88 : vector<8x32xf32>
    %90 = math.tanh %89 : vector<8x32xf32>
    %cst_26 = arith.constant 1.000000e+00 : f32
    %91 = vector.broadcast %cst_26 : f32 to vector<8x32xf32>
    %92 = arith.subf %91, %85 : vector<8x32xf32>
    %93 = arith.mulf %92, %90 : vector<8x32xf32>
    %94 = arith.mulf %85, %68 : vector<8x32xf32>
    %95 = arith.addf %93, %94 : vector<8x32xf32>
    %96 = vector.extract_strided_slice %9 {offsets = [24, 0], sizes = [8, 96], strides = [1, 1]} : vector<64x96xf32> to vector<8x96xf32>
    %97 = arith.truncf %95 : vector<8x32xf32> to vector<8x32xbf16>
    %cst_27 = arith.constant dense<0.000000e+00> : vector<8x96xf32>
    %98 = tpu.matmul %97, %10, %cst_27 {dimension_numbers = #tpu.dot_dimension_numbers<[1], [0], [0], [1], [0, 0, 1, 1], [], []>} : vector<8x32xbf16>, vector<32x96xbf16>, vector<8x96xf32> -> vector<8x96xf32>
    %99 = arith.addf %98, %13 : vector<8x96xf32>
    %100 = arith.addf %96, %99 : vector<8x96xf32>
    %101 = vector.extract_strided_slice %100 {offsets = [0, 0], sizes = [8, 32], strides = [1, 1]} : vector<8x96xf32> to vector<8x32xf32>
    %102 = arith.negf %101 : vector<8x32xf32>
    %103 = math.exp %102 : vector<8x32xf32>
    %cst_28 = arith.constant 1.000000e+00 : f32
    %104 = vector.broadcast %cst_28 : f32 to vector<8x32xf32>
    %105 = arith.addf %104, %103 : vector<8x32xf32>
    %106 = arith.divf %104, %105 : vector<8x32xf32>
    %107 = vector.extract_strided_slice %100 {offsets = [0, 32], sizes = [8, 32], strides = [1, 1]} : vector<8x96xf32> to vector<8x32xf32>
    %108 = arith.negf %107 : vector<8x32xf32>
    %109 = math.exp %108 : vector<8x32xf32>
    %cst_29 = arith.constant 1.000000e+00 : f32
    %110 = vector.broadcast %cst_29 : f32 to vector<8x32xf32>
    %111 = arith.addf %110, %109 : vector<8x32xf32>
    %112 = arith.divf %110, %111 : vector<8x32xf32>
    %113 = vector.extract_strided_slice %96 {offsets = [0, 64], sizes = [8, 32], strides = [1, 1]} : vector<8x96xf32> to vector<8x32xf32>
    %114 = vector.extract_strided_slice %99 {offsets = [0, 64], sizes = [8, 32], strides = [1, 1]} : vector<8x96xf32> to vector<8x32xf32>
    %115 = arith.mulf %106, %114 : vector<8x32xf32>
    %116 = arith.addf %113, %115 : vector<8x32xf32>
    %117 = math.tanh %116 : vector<8x32xf32>
    %cst_30 = arith.constant 1.000000e+00 : f32
    %118 = vector.broadcast %cst_30 : f32 to vector<8x32xf32>
    %119 = arith.subf %118, %112 : vector<8x32xf32>
    %120 = arith.mulf %119, %117 : vector<8x32xf32>
    %121 = arith.mulf %112, %95 : vector<8x32xf32>
    %122 = arith.addf %120, %121 : vector<8x32xf32>
    %123 = vector.extract_strided_slice %9 {offsets = [32, 0], sizes = [8, 96], strides = [1, 1]} : vector<64x96xf32> to vector<8x96xf32>
    %124 = arith.truncf %122 : vector<8x32xf32> to vector<8x32xbf16>
    %cst_31 = arith.constant dense<0.000000e+00> : vector<8x96xf32>
    %125 = tpu.matmul %124, %10, %cst_31 {dimension_numbers = #tpu.dot_dimension_numbers<[1], [0], [0], [1], [0, 0, 1, 1], [], []>} : vector<8x32xbf16>, vector<32x96xbf16>, vector<8x96xf32> -> vector<8x96xf32>
    %126 = arith.addf %125, %13 : vector<8x96xf32>
    %127 = arith.addf %123, %126 : vector<8x96xf32>
    %128 = vector.extract_strided_slice %127 {offsets = [0, 0], sizes = [8, 32], strides = [1, 1]} : vector<8x96xf32> to vector<8x32xf32>
    %129 = arith.negf %128 : vector<8x32xf32>
    %130 = math.exp %129 : vector<8x32xf32>
    %cst_32 = arith.constant 1.000000e+00 : f32
    %131 = vector.broadcast %cst_32 : f32 to vector<8x32xf32>
    %132 = arith.addf %131, %130 : vector<8x32xf32>
    %133 = arith.divf %131, %132 : vector<8x32xf32>
    %134 = vector.extract_strided_slice %127 {offsets = [0, 32], sizes = [8, 32], strides = [1, 1]} : vector<8x96xf32> to vector<8x32xf32>
    %135 = arith.negf %134 : vector<8x32xf32>
    %136 = math.exp %135 : vector<8x32xf32>
    %cst_33 = arith.constant 1.000000e+00 : f32
    %137 = vector.broadcast %cst_33 : f32 to vector<8x32xf32>
    %138 = arith.addf %137, %136 : vector<8x32xf32>
    %139 = arith.divf %137, %138 : vector<8x32xf32>
    %140 = vector.extract_strided_slice %123 {offsets = [0, 64], sizes = [8, 32], strides = [1, 1]} : vector<8x96xf32> to vector<8x32xf32>
    %141 = vector.extract_strided_slice %126 {offsets = [0, 64], sizes = [8, 32], strides = [1, 1]} : vector<8x96xf32> to vector<8x32xf32>
    %142 = arith.mulf %133, %141 : vector<8x32xf32>
    %143 = arith.addf %140, %142 : vector<8x32xf32>
    %144 = math.tanh %143 : vector<8x32xf32>
    %cst_34 = arith.constant 1.000000e+00 : f32
    %145 = vector.broadcast %cst_34 : f32 to vector<8x32xf32>
    %146 = arith.subf %145, %139 : vector<8x32xf32>
    %147 = arith.mulf %146, %144 : vector<8x32xf32>
    %148 = arith.mulf %139, %122 : vector<8x32xf32>
    %149 = arith.addf %147, %148 : vector<8x32xf32>
    %150 = vector.extract_strided_slice %9 {offsets = [40, 0], sizes = [8, 96], strides = [1, 1]} : vector<64x96xf32> to vector<8x96xf32>
    %151 = arith.truncf %149 : vector<8x32xf32> to vector<8x32xbf16>
    %cst_35 = arith.constant dense<0.000000e+00> : vector<8x96xf32>
    %152 = tpu.matmul %151, %10, %cst_35 {dimension_numbers = #tpu.dot_dimension_numbers<[1], [0], [0], [1], [0, 0, 1, 1], [], []>} : vector<8x32xbf16>, vector<32x96xbf16>, vector<8x96xf32> -> vector<8x96xf32>
    %153 = arith.addf %152, %13 : vector<8x96xf32>
    %154 = arith.addf %150, %153 : vector<8x96xf32>
    %155 = vector.extract_strided_slice %154 {offsets = [0, 0], sizes = [8, 32], strides = [1, 1]} : vector<8x96xf32> to vector<8x32xf32>
    %156 = arith.negf %155 : vector<8x32xf32>
    %157 = math.exp %156 : vector<8x32xf32>
    %cst_36 = arith.constant 1.000000e+00 : f32
    %158 = vector.broadcast %cst_36 : f32 to vector<8x32xf32>
    %159 = arith.addf %158, %157 : vector<8x32xf32>
    %160 = arith.divf %158, %159 : vector<8x32xf32>
    %161 = vector.extract_strided_slice %154 {offsets = [0, 32], sizes = [8, 32], strides = [1, 1]} : vector<8x96xf32> to vector<8x32xf32>
    %162 = arith.negf %161 : vector<8x32xf32>
    %163 = math.exp %162 : vector<8x32xf32>
    %cst_37 = arith.constant 1.000000e+00 : f32
    %164 = vector.broadcast %cst_37 : f32 to vector<8x32xf32>
    %165 = arith.addf %164, %163 : vector<8x32xf32>
    %166 = arith.divf %164, %165 : vector<8x32xf32>
    %167 = vector.extract_strided_slice %150 {offsets = [0, 64], sizes = [8, 32], strides = [1, 1]} : vector<8x96xf32> to vector<8x32xf32>
    %168 = vector.extract_strided_slice %153 {offsets = [0, 64], sizes = [8, 32], strides = [1, 1]} : vector<8x96xf32> to vector<8x32xf32>
    %169 = arith.mulf %160, %168 : vector<8x32xf32>
    %170 = arith.addf %167, %169 : vector<8x32xf32>
    %171 = math.tanh %170 : vector<8x32xf32>
    %cst_38 = arith.constant 1.000000e+00 : f32
    %172 = vector.broadcast %cst_38 : f32 to vector<8x32xf32>
    %173 = arith.subf %172, %166 : vector<8x32xf32>
    %174 = arith.mulf %173, %171 : vector<8x32xf32>
    %175 = arith.mulf %166, %149 : vector<8x32xf32>
    %176 = arith.addf %174, %175 : vector<8x32xf32>
    %177 = vector.extract_strided_slice %9 {offsets = [48, 0], sizes = [8, 96], strides = [1, 1]} : vector<64x96xf32> to vector<8x96xf32>
    %178 = arith.truncf %176 : vector<8x32xf32> to vector<8x32xbf16>
    %cst_39 = arith.constant dense<0.000000e+00> : vector<8x96xf32>
    %179 = tpu.matmul %178, %10, %cst_39 {dimension_numbers = #tpu.dot_dimension_numbers<[1], [0], [0], [1], [0, 0, 1, 1], [], []>} : vector<8x32xbf16>, vector<32x96xbf16>, vector<8x96xf32> -> vector<8x96xf32>
    %180 = arith.addf %179, %13 : vector<8x96xf32>
    %181 = arith.addf %177, %180 : vector<8x96xf32>
    %182 = vector.extract_strided_slice %181 {offsets = [0, 0], sizes = [8, 32], strides = [1, 1]} : vector<8x96xf32> to vector<8x32xf32>
    %183 = arith.negf %182 : vector<8x32xf32>
    %184 = math.exp %183 : vector<8x32xf32>
    %cst_40 = arith.constant 1.000000e+00 : f32
    %185 = vector.broadcast %cst_40 : f32 to vector<8x32xf32>
    %186 = arith.addf %185, %184 : vector<8x32xf32>
    %187 = arith.divf %185, %186 : vector<8x32xf32>
    %188 = vector.extract_strided_slice %181 {offsets = [0, 32], sizes = [8, 32], strides = [1, 1]} : vector<8x96xf32> to vector<8x32xf32>
    %189 = arith.negf %188 : vector<8x32xf32>
    %190 = math.exp %189 : vector<8x32xf32>
    %cst_41 = arith.constant 1.000000e+00 : f32
    %191 = vector.broadcast %cst_41 : f32 to vector<8x32xf32>
    %192 = arith.addf %191, %190 : vector<8x32xf32>
    %193 = arith.divf %191, %192 : vector<8x32xf32>
    %194 = vector.extract_strided_slice %177 {offsets = [0, 64], sizes = [8, 32], strides = [1, 1]} : vector<8x96xf32> to vector<8x32xf32>
    %195 = vector.extract_strided_slice %180 {offsets = [0, 64], sizes = [8, 32], strides = [1, 1]} : vector<8x96xf32> to vector<8x32xf32>
    %196 = arith.mulf %187, %195 : vector<8x32xf32>
    %197 = arith.addf %194, %196 : vector<8x32xf32>
    %198 = math.tanh %197 : vector<8x32xf32>
    %cst_42 = arith.constant 1.000000e+00 : f32
    %199 = vector.broadcast %cst_42 : f32 to vector<8x32xf32>
    %200 = arith.subf %199, %193 : vector<8x32xf32>
    %201 = arith.mulf %200, %198 : vector<8x32xf32>
    %202 = arith.mulf %193, %176 : vector<8x32xf32>
    %203 = arith.addf %201, %202 : vector<8x32xf32>
    %204 = vector.extract_strided_slice %9 {offsets = [56, 0], sizes = [8, 96], strides = [1, 1]} : vector<64x96xf32> to vector<8x96xf32>
    %205 = arith.truncf %203 : vector<8x32xf32> to vector<8x32xbf16>
    %cst_43 = arith.constant dense<0.000000e+00> : vector<8x96xf32>
    %206 = tpu.matmul %205, %10, %cst_43 {dimension_numbers = #tpu.dot_dimension_numbers<[1], [0], [0], [1], [0, 0, 1, 1], [], []>} : vector<8x32xbf16>, vector<32x96xbf16>, vector<8x96xf32> -> vector<8x96xf32>
    %207 = arith.addf %206, %13 : vector<8x96xf32>
    %208 = arith.addf %204, %207 : vector<8x96xf32>
    %209 = vector.extract_strided_slice %208 {offsets = [0, 0], sizes = [8, 32], strides = [1, 1]} : vector<8x96xf32> to vector<8x32xf32>
    %210 = arith.negf %209 : vector<8x32xf32>
    %211 = math.exp %210 : vector<8x32xf32>
    %cst_44 = arith.constant 1.000000e+00 : f32
    %212 = vector.broadcast %cst_44 : f32 to vector<8x32xf32>
    %213 = arith.addf %212, %211 : vector<8x32xf32>
    %214 = arith.divf %212, %213 : vector<8x32xf32>
    %215 = vector.extract_strided_slice %208 {offsets = [0, 32], sizes = [8, 32], strides = [1, 1]} : vector<8x96xf32> to vector<8x32xf32>
    %216 = arith.negf %215 : vector<8x32xf32>
    %217 = math.exp %216 : vector<8x32xf32>
    %cst_45 = arith.constant 1.000000e+00 : f32
    %218 = vector.broadcast %cst_45 : f32 to vector<8x32xf32>
    %219 = arith.addf %218, %217 : vector<8x32xf32>
    %220 = arith.divf %218, %219 : vector<8x32xf32>
    %221 = vector.extract_strided_slice %204 {offsets = [0, 64], sizes = [8, 32], strides = [1, 1]} : vector<8x96xf32> to vector<8x32xf32>
    %222 = vector.extract_strided_slice %207 {offsets = [0, 64], sizes = [8, 32], strides = [1, 1]} : vector<8x96xf32> to vector<8x32xf32>
    %223 = arith.mulf %214, %222 : vector<8x32xf32>
    %224 = arith.addf %221, %223 : vector<8x32xf32>
    %225 = math.tanh %224 : vector<8x32xf32>
    %cst_46 = arith.constant 1.000000e+00 : f32
    %226 = vector.broadcast %cst_46 : f32 to vector<8x32xf32>
    %227 = arith.subf %226, %220 : vector<8x32xf32>
    %228 = arith.mulf %227, %225 : vector<8x32xf32>
    %229 = arith.mulf %220, %203 : vector<8x32xf32>
    %230 = arith.addf %228, %229 : vector<8x32xf32>
    %c0_47 = arith.constant 0 : index
    %c0_48 = arith.constant 0 : index
    %231 = vector.load %arg7[%c0_47, %c0_48] : memref<32x16xf32, #tpu.memory_space<vmem>>, vector<32x16xf32>
    %cst_49 = arith.constant dense<0.000000e+00> : vector<8x16xf32>
    %232 = tpu.matmul %230, %231, %cst_49 {dimension_numbers = #tpu.dot_dimension_numbers<[1], [0], [0], [1], [0, 0, 1, 1], [], []>} : vector<8x32xf32>, vector<32x16xf32>, vector<8x16xf32> -> vector<8x16xf32>
    %c0_50 = arith.constant 0 : index
    %c0_51 = arith.constant 0 : index
    %233 = vector.load %arg8[%c0_50, %c0_51] : memref<1x16xf32, #tpu.memory_space<vmem>>, vector<1x16xf32>
    %234 = vector.broadcast %233 : vector<1x16xf32> to vector<8x16xf32>
    %235 = arith.addf %232, %234 : vector<8x16xf32>
    %236 = arith.negf %235 : vector<8x16xf32>
    %237 = math.exp %236 : vector<8x16xf32>
    %cst_52 = arith.constant 1.000000e+00 : f32
    %238 = vector.broadcast %cst_52 : f32 to vector<8x16xf32>
    %239 = arith.addf %238, %237 : vector<8x16xf32>
    %240 = arith.divf %238, %239 : vector<8x16xf32>
    %c0_53 = arith.constant 0 : index
    %c0_54 = arith.constant 0 : index
    %241 = vector.load %arg11[%c0_53, %c0_54] : memref<8x16xf32, #tpu.memory_space<vmem>>, vector<8x16xf32>
    tpu.vector_store %arg11[%c0_53, %c0_54], %240 {strides = array<i32>} : memref<8x16xf32, #tpu.memory_space<vmem>>, vector<8x16xf32>,
    %c0_55 = arith.constant 0 : index
    %c0_56 = arith.constant 0 : index
    %242 = vector.load %arg9[%c0_55, %c0_56] : memref<8x16xf32, #tpu.memory_space<vmem>>, vector<8x16xf32>
    %cst_57 = arith.constant 0.000000e+00 : f32
    %243 = vector.broadcast %cst_57 : f32 to vector<8x16xf32>
    %244 = arith.maximumf %240, %243 : vector<8x16xf32>
    %245 = arith.mulf %240, %242 : vector<8x16xf32>
    %246 = arith.subf %244, %245 : vector<8x16xf32>
    %247 = math.absf %240 : vector<8x16xf32>
    %cst_58 = arith.constant 0.000000e+00 : f32
    %248 = vector.broadcast %cst_58 : f32 to vector<8x16xf32>
    %249 = arith.subf %248, %247 : vector<8x16xf32>
    %250 = math.exp %249 : vector<8x16xf32>
    %251 = math.log1p %250 : vector<8x16xf32>
    %252 = arith.addf %246, %251 : vector<8x16xf32>
    %c0_59 = arith.constant 0 : index
    %c0_60 = arith.constant 0 : index
    %253 = vector.load %arg10[%c0_59, %c0_60] : memref<8x1xf32, #tpu.memory_space<vmem>>, vector<8x1xf32>
    %254 = vector.broadcast %253 : vector<8x1xf32> to vector<8x16xf32>
    %255 = arith.mulf %252, %254 : vector<8x16xf32>
    %cst_61 = arith.constant dense<0.000000e+00> : vector<16xf32>
    %256 = vector.multi_reduction <add>, %255, %cst_61 [0] : vector<8x16xf32> to vector<16xf32>
    %257 = vector.shape_cast %256 : vector<16xf32> to vector<1x16xf32>
    %cst_62 = arith.constant dense<0.000000e+00> : vector<1xf32>
    %258 = vector.multi_reduction <add>, %257, %cst_62 [1] : vector<1x16xf32> to vector<1xf32>
    %259 = vector.shape_cast %258 : vector<1xf32> to vector<1x1xf32>
    %cst_63 = arith.constant 1.562500e-02 : f32
    %260 = vector.broadcast %cst_63 : f32 to vector<1x1xf32>
    %261 = arith.mulf %259, %260 : vector<1x1xf32>
    %c0_64 = arith.constant 0 : index
    %c0_65 = arith.constant 0 : index
    %262 = vector.load %arg12[%c0_64, %c0_65] : memref<1x1xf32, #tpu.memory_space<vmem>>, vector<1x1xf32>
    tpu.vector_store %arg12[%c0_64, %c0_65], %261 {strides = array<i32>} : memref<1x1xf32, #tpu.memory_space<vmem>>, vector<1x1xf32>,
    return
  }
}

</mosaic_0001>

<bundles_post_ra>
// kernel: vanilla_rnn_forward.1
= control target key start
LH: loop header
LB: loop body
LE: loop exit
PB: predicated region body
PF: predicated region fallthrough
CT: control target
= control target key end

     0   :  { %vm101_vm0 = vcmask 1044480   ;;  %vm212_vm1 = vcmask 1042432   ;;  %vm88_vm2 = vcmask 80896   ;;  %v1328_v7 = vmov 0.0   ;;  %s1618_s0 = inlined_call_operand.vmem [shape: bf16[64,22], index: 0, kind: input, shape index: {}]   ;;  %s1619_s1 = inlined_call_operand.vmem [shape: bf16[64,10], index: 1, kind: input, shape index: {}]   ;;  %s1620_s2 = inlined_call_operand.vmem [shape: bf16[22,96], index: 2, kind: input, shape index: {}]   ;;  %s1621_s3 = inlined_call_operand.vmem [shape: bf16[10,96], index: 3, kind: input, shape index: {}]   ;;  %s1622_s4 = inlined_call_operand.vmem [shape: bf16[32,96], index: 4, kind: input, shape index: {}]   ;;  %s1623_s5 = inlined_call_operand.vmem [shape: f32[1,96], index: 5, kind: input, shape index: {}]   ;;  %s1624_s6 = inlined_call_operand.vmem [shape: f32[1,96], index: 6, kind: input, shape index: {}]   ;;  %s1625_s7 = inlined_call_operand.vmem [shape: f32[32,16], index: 7, kind: input, shape index: {}]   ;;  %s1626_s8 = inlined_call_operand.vmem [shape: f32[1,16], index: 8, kind: input, shape index: {}]   ;;  %s1627_s9 = inlined_call_operand.vmem [shape: f32[8,16], index: 9, kind: input, shape index: {}]   ;;  %s1628_s10 = inlined_call_operand.vmem [shape: f32[8,1], index: 10, kind: input, shape index: {}]   ;;  %s1629_s11 = inlined_call_operand.vmem [shape: f32[8,16], index: 11, kind: output, shape index: {0}]   ;;  %s1630_s12 = inlined_call_operand.hbm [shape: f32[1,1], index: 12, kind: output, shape index: {1}]  }
   0x1   :  { %v1237_v0 = vld [vmem:[%s1621_s3] sm:$0x1f]   ;;  %v1238_v1 = vld [vmem:[%s1620_s2 + $0x8] ss:$0 sps:$4 sm:$0x77]   ;;  %vm199_vm3 = vcmask 179200  }
   0x2   :  { %1228 = vmatprep.subr.msk.bf16.mxu0 %vm101_vm0, %v1237_v0  ;;  %v103_v2 = vsel %vm101_vm0, %v1237_v0, 0  ;;  %1229 = vmatprep.subr.msk.bf16.mxu1 %vm212_vm1, %v1238_v1  ;;  %v214_v3 = vsel %vm212_vm1, %v1238_v1, 0  ;;  %v1239_v4 = vld [vmem:[%s1619_s1] sm:$0xff]   ;;  %v1240_v5 = vld [vmem:[%s1619_s1 + $0x8] sm:$0xff]   ;;  %v1245_v11 = vld [vmem:[%s1619_s1 + $0x10] sm:$0xff]   ;;  %v1329_v13 = vmov 0  }
   0x3   :  { %1132 = vmatpush3.bf16.msra.mxu0 %v103_v2  ;;  %1142 = vmatpush3.bf16.msra.mxu1 %v214_v3  ;;  %v1241_v6 = vld [vmem:[%s1620_s2] sm:$0xff]   ;;  %v1420_v8 = vld [vmem:[%s1622_s4 + $0x8] sm:$0xff]   ;;  %v1246_v12 = vld [vmem:[%s1619_s1 + $0x18] sm:$0xff]  }
   0x4   :  { %1133 = vmatprep.mubr.msk.bf16.mxu0 %vm88_vm2, %v1239_v4  ;;  %1153 = vmatprep.subr.bf16.mxu0 %v1328_v7  ;;  %v1243_v9 = vld [vmem:[%s1618_s0] sm:$0xff]   ;;  %v1244_v10 = vld [vmem:[%s1618_s0 + $0x8] sm:$0xff]   ;;  %v1248_v15 = vld [vmem:[%s1618_s0 + $0x10] sm:$0xff]  }
   0x5   :  { %1143 = vmatprep.subr.bf16.mxu1 %v1241_v6  ;;  %1145 = vmatprep.mubr.msk.bf16.mxu1 %vm199_vm3, %v1243_v9  ;;  %v1443_v14 = vld [vmem:[%s1622_s4] sm:$0xff]  }
   0x6   :  { %1134 = vmatmul.mubr.msk.bf16.vlgmr.msra.gmra.mxu0 %vm88_vm2, %v1240_v5  ;;  %1236 = vset.pattern.permute.xlu0 %v1329_v13 }
   0x7   :  { %1144 = vmatpush3.bf16.msra.mxu1 %v1241_v6  ;;  %1154 = vmatpush3.bf16.msra.mxu0 %v1420_v8 }
   0x8   :  { %1155 = vmatprep.subr.bf16.mxu0 %v1328_v7  ;;  %1161 = vmatprep.subr.bf16.mxu1 %v1328_v7 }
   0x9   :  { %1137 = vmatprep.mubr.msk.bf16.mxu0 %vm88_vm2, %v1245_v11 }
   0xa   :  { %1146 = vmatmul.mubr.msk.bf16.vlgmr.msra.gmra.mxu1 %vm199_vm3, %v1244_v10 }
   0xb   :  { %1162 = vmatpush3.bf16.msra.mxu1 %v1420_v8  ;;  %1156 = vmatpush3.bf16.msra.mxu0 %v1443_v14 }
   0xc   :  { %1163 = vmatprep.subr.bf16.mxu1 %v1328_v7 }
   0xd   :  { %18 = vsyncpa [#allocation3], 0  ;;  %1149 = vmatprep.mubr.msk.bf16.mxu1 %vm199_vm3, %v1248_v15  ;;  %v1249_v16 = vld [vmem:[%s1618_s0 + $0x18] sm:$0xff]   ;;  %vm1330_vm4 = vmmov 0   ;;  %1169 = vmatprep.subr.bf16.mxu0 %v1328_v7  ;;  %v1069_v21 = vld [vmem:[%s1623_s5] ss:$0 sm:$0xff] }
   0xe   :  { %1138 = vmatmul.mubr.msk.bf16.gmra.mxu0 %vm88_vm2, %v1246_v12  ;;  %v1482_v38 = vld [vmem:[%s1624_s6] ss:$0 sm:$0xff]  ;;  %s1331_s27 = smov 64   ;;  %s1332_s6 = smov 96   ;;  %vm319_vm5 = vcmask 261120   ;;  %vm992_vm6 = vcmask 130048  }
   0xf   :  { %1157 = vmatprep.mubr.msk.bf16.mxu0 %vm1330_vm4, %v1328_v7  ;;  %1164 = vmatpush3.bf16.msra.mxu1 %v1443_v14  ;;  %vm1030_vm8 = vcmask 0  }
  0x10   :  { %1177 = vmatprep.subr.bf16.mxu1 %v1328_v7 }
  0x12   :  { %1150 = vmatmul.mubr.msk.bf16.gmra.mxu1 %vm199_vm3, %v1249_v16 }
  0x13   :  { %1165 = vmatprep.mubr.msk.bf16.mxu1 %vm1330_vm4, %v1328_v7 }
  0x16   :  { %1158 = vmatmul.mubr.bf16.vlgmr.msra.gmra.mxu0 %v1329_v13 }
  0x17   :  { %1170 = vmatpush3.bf16.msra.mxu0 %v1420_v8  ;;  %1173 = vmatprep.mubr.msk.bf16.mxu0 %vm1330_vm4, %v1328_v7 }
  0x18   :  { %1171 = vmatprep.subr.bf16.mxu0 %v1328_v7 }
  0x1b   :  { %1172 = vmatpush3.bf16.msra.mxu0 %v1443_v14 }
  0x1c   :  { %1185 = vmatprep.subr.bf16.mxu0 %v1328_v7 }
  0xc6   :  { %v1135_v17 = vpop.f32.mrf.mxu0 }
  0xc8   :  { %v139_v18 = vpop.f32.mrf.mxu0 }
  0xca   :  { %v1136_v19 = vpop.f32.mrf.mxu0  ;;  %v1147_v20 = vpop.f32.mrf.mxu1 }
  0xcb   :  { %v259_v22 = vadd.f32 %v1147_v20, %v1135_v17 }
  0xcc   :  { %v142_v23 = vpop.f32.mrf.mxu0  ;;  %v250_v24 = vpop.f32.mrf.mxu1 }
  0xcd   :  { %v1473_v25 = vadd.f32 %v1069_v21, %v259_v22  ;;  %v251_v54 = vadd.f32 %v250_v24, %v139_v18 }
  0xce   :  { %v1139_v26 = vpop.f32.mrf.mxu0  ;;  %v1148_v27 = vpop.f32.mrf.mxu1 }
  0xcf   :  { %v262_v28 = vadd.f32 %v1148_v27, %v1136_v19  ;;  %v288_v55 = vadd.f32 %v1069_v21, %v251_v54 }
  0xd0   :  { %v155_v29 = vpop.f32.mrf.mxu0  ;;  %v253_v30 = vpop.f32.mrf.mxu1 }
  0xd1   :  { %v1475_v31 = vadd.f32 %v1069_v21, %v262_v28  ;;  %v254_v32 = vadd.f32 %v253_v30, %v142_v23 }
  0xd2   :  { %v1140_v33 = vpop.f32.mrf.mxu0  ;;  %v1151_v34 = vpop.f32.mrf.mxu1 }
  0xd3   :  { %v1477_v35 = vadd.f32 %v1069_v21, %v254_v32  ;;  %v275_v36 = vadd.f32 %v1151_v34, %v1139_v26 }
  0xd4   :  { %v158_v37 = vpop.f32.mrf.mxu0  ;;  %v266_v39 = vpop.f32.mrf.mxu1 }
  0xd5   :  { %v1484_v40 = vadd.f32 %v1069_v21, %v275_v36  ;;  %v267_v41 = vadd.f32 %v266_v39, %v155_v29 }
  0xd6   :  { %v357_v42 = vpop.f32.mrf.mxu0  ;;  %v1152_v43 = vpop.f32.mrf.mxu1 }
  0xd7   :  { %v358_v44 = vadd.f32 %v1482_v38, %v357_v42  ;;  %v1487_v45 = vadd.f32 %v1069_v21, %v267_v41  ;;  %v278_v46 = vadd.f32 %v1152_v43, %v1140_v33 }
  0xd8   :  { %v1159_v47 = vpop.f32.mrf.mxu0  ;;  %v269_v48 = vpop.f32.mrf.mxu1 }
  0xd9   :  { %371 = vrot.lane.b32.xlu0 %v358_v44, %s1331_s27  ;;  %v1490_v49 = vadd.f32 %v1069_v21, %v278_v46  ;;  %v270_v50 = vadd.f32 %v269_v48, %v158_v37  ;;  %v363_v56 = vadd.f32 %v358_v44, %v288_v55 }
  0xda   :  { %v360_v51 = vpop.f32.mrf.mxu0 }
  0xdb   :  { %v1492_v52 = vadd.f32 %v1069_v21, %v270_v50  ;;  %v1073_v57 = vmul.f32 -1.442695, %v363_v56 }
  0xdc   :  { %v1160_v53 = vpop.f32.mrf.mxu0 }
  0xdd   :  { %1250 = vpow2.f32 %v1073_v57 }
  0xea   :  { %v1251_v58 = vpop.eup %1250 }
  0xeb   :  { %v367_v59 = vadd.f32 1.0, %v1251_v58 }
  0xed   :  { %1252 = vrcp.f32 %v367_v59 }
  0xfa   :  { %v1253_v60 = vpop.eup %1252 }
  0xfb   :  { %v381_v2 = vsub.f32 1.0, %v1253_v60  ;;  %v387_v4 = vmul.f32 0.0, %v1253_v60 }
 0x14b   :  { %v372_v61 = vpop.permute.xlu0 %371 }
 0x14c   :  { %v374_v62 = vmul.f32 %v1253_v60, %v372_v61 }
 0x14e   :  { %376 = vrot.lane.b32.xlu0 %v374_v62, %s1331_s27 }
 0x1c0   :  { %v377_v63 = vpop.permute.xlu0 %376 }
 0x1c1   :  { %v379_v0 = vadd.f32 %v377_v63, %v288_v55 }
 0x1c3   :  { %1254 = vtanh.f32 %v379_v0 }
 0x1d0   :  { %v1255_v1 = vpop.eup %1254 }
 0x1d1   :  { %383 = vrot.lane.b32.xlu1 %v1255_v1, %s1332_s6 }
 0x243   :  { %v384_v3 = vpop.permute.xlu1 %383 }
 0x244   :  { %v386_v5 = vmul.f32 %v384_v3, %v381_v2 }
 0x246   :  { %v388_v6 = vadd.f32 %v387_v4, %v386_v5 }
 0x248   :  { %v389_v9 = vpack.c.bf16 %v388_v6, %v388_v6 }
 0x24a   :  { %391 = vrot.lane.b32.xlu1 %v389_v9, %s1332_s6 }
 0x2bc   :  { %v392_v10 = vpop.permute.xlu1 %391 }
 0x2bd   :  { %1166 = vmatmul.mubr.msk.bf16.vlgmr.msra.gmra.mxu1 %vm319_vm5, %v392_v10 }
 0x2be   :  { %1178 = vmatpush3.bf16.msra.mxu1 %v1420_v8  ;;  %1181 = vmatprep.mubr.msk.bf16.mxu1 %vm1330_vm4, %v1328_v7 }
 0x2bf   :  { %1179 = vmatprep.subr.bf16.mxu1 %v1328_v7 }
 0x2c2   :  { %1180 = vmatpush3.bf16.msra.mxu1 %v1443_v14 }
 0x2c3   :  { %1193 = vmatprep.subr.bf16.mxu1 %v1328_v7 }
 0x37d   :  { %v430_v11 = vpop.f32.mrf.mxu1 }
 0x37e   :  { %v431_v12 = vadd.f32 %v1482_v38, %v430_v11 }
 0x37f   :  { %v1167_v13 = vpop.f32.mrf.mxu1 }
 0x380   :  { %444 = vrot.lane.b32.xlu0 %v431_v12, %s1331_s27  ;;  %v436_v17 = vadd.f32 %v431_v12, %v1477_v35 }
 0x381   :  { %v433_v15 = vpop.f32.mrf.mxu1 }
 0x382   :  { %v1075_v18 = vmul.f32 -1.442695, %v436_v17 }
 0x383   :  { %v1168_v16 = vpop.f32.mrf.mxu1 }
 0x384   :  { %1256 = vpow2.f32 %v1075_v18 }
 0x391   :  { %v1257_v19 = vpop.eup %1256 }
 0x392   :  { %v440_v20 = vadd.f32 1.0, %v1257_v19 }
 0x394   :  { %1258 = vrcp.f32 %v440_v20 }
 0x3a1   :  { %v1259_v21 = vpop.eup %1258 }
 0x3a2   :  { %v454_v28 = vsub.f32 1.0, %v1259_v21  ;;  %v460_v30 = vmul.f32 %v1259_v21, %v388_v6 }
 0x3f2   :  { %v445_v22 = vpop.permute.xlu0 %444 }
 0x3f3   :  { %v447_v23 = vmul.f32 %v1259_v21, %v445_v22 }
 0x3f5   :  { %449 = vrot.lane.b32.xlu1 %v447_v23, %s1331_s27 }
 0x467   :  { %v450_v24 = vpop.permute.xlu1 %449 }
 0x468   :  { %v452_v26 = vadd.f32 %v450_v24, %v1477_v35 }
 0x46a   :  { %1260 = vtanh.f32 %v452_v26 }
 0x477   :  { %v1261_v27 = vpop.eup %1260 }
 0x478   :  { %456 = vrot.lane.b32.xlu0 %v1261_v27, %s1332_s6 }
 0x4ea   :  { %v457_v29 = vpop.permute.xlu0 %456 }
 0x4eb   :  { %v459_v32 = vmul.f32 %v457_v29, %v454_v28 }
 0x4ed   :  { %v461_v33 = vadd.f32 %v460_v30, %v459_v32 }
 0x4ef   :  { %v462_v34 = vpack.c.bf16 %v461_v33, %v461_v33 }
 0x4f1   :  { %464 = vrot.lane.b32.xlu1 %v462_v34, %s1332_s6 }
 0x563   :  { %v465_v36 = vpop.permute.xlu1 %464 }
 0x564   :  { %1174 = vmatmul.mubr.msk.bf16.vlgmr.msra.gmra.mxu0 %vm319_vm5, %v465_v36 }
 0x565   :  { %1186 = vmatpush3.bf16.msra.mxu0 %v1420_v8  ;;  %1189 = vmatprep.mubr.msk.bf16.mxu0 %vm1330_vm4, %v1328_v7 }
 0x566   :  { %1187 = vmatprep.subr.bf16.mxu0 %v1328_v7 }
 0x569   :  { %1188 = vmatpush3.bf16.msra.mxu0 %v1443_v14 }
 0x56a   :  { %1201 = vmatprep.subr.bf16.mxu0 %v1328_v7 }
 0x624   :  { %v503_v35 = vpop.f32.mrf.mxu0 }
 0x625   :  { %v504_v37 = vadd.f32 %v1482_v38, %v503_v35 }
 0x626   :  { %v1175_v39 = vpop.f32.mrf.mxu0 }
 0x627   :  { %517 = vrot.lane.b32.xlu0 %v504_v37, %s1331_s27  ;;  %v509_v43 = vadd.f32 %v504_v37, %v1473_v25 }
 0x628   :  { %v506_v41 = vpop.f32.mrf.mxu0 }
 0x629   :  { %v1077_v44 = vmul.f32 -1.442695, %v509_v43 }
 0x62a   :  { %v1176_v42 = vpop.f32.mrf.mxu0 }
 0x62b   :  { %1262 = vpow2.f32 %v1077_v44 }
 0x638   :  { %v1263_v46 = vpop.eup %1262 }
 0x639   :  { %v513_v47 = vadd.f32 1.0, %v1263_v46 }
 0x63b   :  { %1264 = vrcp.f32 %v513_v47 }
 0x648   :  { %v1265_v48 = vpop.eup %1264 }
 0x649   :  { %v527_v56 = vsub.f32 1.0, %v1265_v48  ;;  %v533_v58 = vmul.f32 %v1265_v48, %v461_v33 }
 0x699   :  { %v518_v50 = vpop.permute.xlu0 %517 }
 0x69a   :  { %v520_v51 = vmul.f32 %v1265_v48, %v518_v50 }
 0x69c   :  { %522 = vrot.lane.b32.xlu1 %v520_v51, %s1331_s27 }
 0x70e   :  { %v523_v53 = vpop.permute.xlu1 %522 }
 0x70f   :  { %v525_v54 = vadd.f32 %v523_v53, %v1473_v25 }
 0x711   :  { %1266 = vtanh.f32 %v525_v54 }
 0x71e   :  { %v1267_v55 = vpop.eup %1266 }
 0x71f   :  { %529 = vrot.lane.b32.xlu0 %v1267_v55, %s1332_s6 }
 0x791   :  { %v530_v57 = vpop.permute.xlu0 %529 }
 0x792   :  { %v532_v59 = vmul.f32 %v530_v57, %v527_v56 }
 0x794   :  { %v534_v60 = vadd.f32 %v533_v58, %v532_v59 }
 0x796   :  { %v535_v61 = vpack.c.bf16 %v534_v60, %v534_v60 }
 0x798   :  { %537 = vrot.lane.b32.xlu1 %v535_v61, %s1332_s6 }
 0x80a   :  { %v538_v62 = vpop.permute.xlu1 %537 }
 0x80b   :  { %1182 = vmatmul.mubr.msk.bf16.vlgmr.msra.gmra.mxu1 %vm319_vm5, %v538_v62 }
 0x80c   :  { %1194 = vmatpush3.bf16.msra.mxu1 %v1420_v8  ;;  %1197 = vmatprep.mubr.msk.bf16.mxu1 %vm1330_vm4, %v1328_v7 }
 0x80d   :  { %1195 = vmatprep.subr.bf16.mxu1 %v1328_v7 }
 0x810   :  { %1196 = vmatpush3.bf16.msra.mxu1 %v1443_v14 }
 0x811   :  { %1209 = vmatprep.subr.bf16.mxu1 %v1328_v7 }
 0x8cb   :  { %v576_v25 = vpop.f32.mrf.mxu1 }
 0x8cc   :  { %v577_v63 = vadd.f32 %v1482_v38, %v576_v25 }
 0x8cd   :  { %v1183_v0 = vpop.f32.mrf.mxu1 }
 0x8ce   :  { %590 = vrot.lane.b32.xlu0 %v577_v63, %s1331_s27  ;;  %v582_v3 = vadd.f32 %v577_v63, %v1475_v31 }
 0x8cf   :  { %v579_v1 = vpop.f32.mrf.mxu1 }
 0x8d0   :  { %v1079_v4 = vmul.f32 -1.442695, %v582_v3 }
 0x8d1   :  { %v1184_v2 = vpop.f32.mrf.mxu1 }
 0x8d2   :  { %1268 = vpow2.f32 %v1079_v4 }
 0x8df   :  { %v1269_v5 = vpop.eup %1268 }
 0x8e0   :  { %v586_v6 = vadd.f32 1.0, %v1269_v5 }
 0x8e2   :  { %1270 = vrcp.f32 %v586_v6 }
 0x8ef   :  { %v1271_v9 = vpop.eup %1270 }
 0x8f0   :  { %v600_v16 = vsub.f32 1.0, %v1271_v9  ;;  %v606_v18 = vmul.f32 %v1271_v9, %v534_v60 }
 0x940   :  { %v591_v10 = vpop.permute.xlu0 %590 }
 0x941   :  { %v593_v11 = vmul.f32 %v1271_v9, %v591_v10 }
 0x943   :  { %595 = vrot.lane.b32.xlu1 %v593_v11, %s1331_s27 }
 0x9b5   :  { %v596_v12 = vpop.permute.xlu1 %595 }
 0x9b6   :  { %v598_v13 = vadd.f32 %v596_v12, %v1475_v31 }
 0x9b8   :  { %1272 = vtanh.f32 %v598_v13 }
 0x9c5   :  { %v1273_v15 = vpop.eup %1272 }
 0x9c6   :  { %602 = vrot.lane.b32.xlu0 %v1273_v15, %s1332_s6 }
 0xa38   :  { %v603_v17 = vpop.permute.xlu0 %602 }
 0xa39   :  { %v605_v19 = vmul.f32 %v603_v17, %v600_v16 }
 0xa3b   :  { %v607_v20 = vadd.f32 %v606_v18, %v605_v19 }
 0xa3d   :  { %v608_v21 = vpack.c.bf16 %v607_v20, %v607_v20 }
 0xa3f   :  { %610 = vrot.lane.b32.xlu1 %v608_v21, %s1332_s6 }
 0xab1   :  { %v611_v22 = vpop.permute.xlu1 %610 }
 0xab2   :  { %1190 = vmatmul.mubr.msk.bf16.vlgmr.msra.gmra.mxu0 %vm319_vm5, %v611_v22 }
 0xab3   :  { %1202 = vmatpush3.bf16.msra.mxu0 %v1420_v8  ;;  %1205 = vmatprep.mubr.msk.bf16.mxu0 %vm1330_vm4, %v1328_v7 }
 0xab4   :  { %1203 = vmatprep.subr.bf16.mxu0 %v1328_v7 }
 0xab7   :  { %1204 = vmatpush3.bf16.msra.mxu0 %v1443_v14 }
 0xab8   :  { %1217 = vmatprep.subr.mxu0 %v1328_v7 }
 0xb72   :  { %v649_v31 = vpop.f32.mrf.mxu0 }
 0xb73   :  { %v650_v23 = vadd.f32 %v1482_v38, %v649_v31 }
 0xb74   :  { %v1191_v24 = vpop.f32.mrf.mxu0 }
 0xb75   :  { %663 = vrot.lane.b32.xlu0 %v650_v23, %s1331_s27  ;;  %v655_v28 = vadd.f32 %v650_v23, %v1487_v45 }
 0xb76   :  { %v652_v26 = vpop.f32.mrf.mxu0 }
 0xb77   :  { %v1081_v29 = vmul.f32 -1.442695, %v655_v28 }
 0xb78   :  { %v1192_v27 = vpop.f32.mrf.mxu0 }
 0xb79   :  { %1274 = vpow2.f32 %v1081_v29 }
 0xb86   :  { %v1275_v30 = vpop.eup %1274 }
 0xb87   :  { %v659_v32 = vadd.f32 1.0, %v1275_v30 }
 0xb89   :  { %1276 = vrcp.f32 %v659_v32 }
 0xb96   :  { %v1277_v33 = vpop.eup %1276 }
 0xb97   :  { %v673_v41 = vsub.f32 1.0, %v1277_v33  ;;  %v679_v43 = vmul.f32 %v1277_v33, %v607_v20 }
 0xbe7   :  { %v664_v34 = vpop.permute.xlu0 %663 }
 0xbe8   :  { %v666_v36 = vmul.f32 %v1277_v33, %v664_v34 }
 0xbea   :  { %668 = vrot.lane.b32.xlu1 %v666_v36, %s1331_s27 }
 0xc5c   :  { %v669_v35 = vpop.permute.xlu1 %668 }
 0xc5d   :  { %v671_v37 = vadd.f32 %v669_v35, %v1487_v45 }
 0xc5f   :  { %1278 = vtanh.f32 %v671_v37 }
 0xc6c   :  { %v1279_v39 = vpop.eup %1278 }
 0xc6d   :  { %675 = vrot.lane.b32.xlu0 %v1279_v39, %s1332_s6 }
 0xcdf   :  { %v676_v42 = vpop.permute.xlu0 %675 }
 0xce0   :  { %v678_v44 = vmul.f32 %v676_v42, %v673_v41 }
 0xce2   :  { %v680_v46 = vadd.f32 %v679_v43, %v678_v44  ;;  %v903_v44 = vld [vmem:[%s1625_s7 + $0x18] sm:$0xff] }
 0xce4   :  { %v681_v47 = vpack.c.bf16 %v680_v46, %v680_v46 }
 0xce6   :  { %683 = vrot.lane.b32.xlu1 %v681_v47, %s1332_s6  ;;  %v901_v47 = vld [vmem:[%s1625_s7 + $0x8] sm:$0xff] }
 0xd58   :  { %v684_v48 = vpop.permute.xlu1 %683 }
 0xd59   :  { %1198 = vmatmul.mubr.msk.bf16.vlgmr.msra.gmra.mxu1 %vm319_vm5, %v684_v48 }
 0xd5a   :  { %1210 = vmatpush3.bf16.msra.mxu1 %v1420_v8  ;;  %1213 = vmatprep.mubr.msk.bf16.mxu1 %vm1330_vm4, %v1328_v7 }
 0xd5b   :  { %1211 = vmatprep.subr.bf16.mxu1 %v1328_v7 }
 0xd5e   :  { %1212 = vmatpush3.bf16.msra.mxu1 %v1443_v14 }
 0xe19   :  { %v722_v45 = vpop.f32.mrf.mxu1 }
 0xe1a   :  { %v723_v50 = vadd.f32 %v1482_v38, %v722_v45  ;;  %v1012_v45 = vld [vmem:[%s1628_s10] sm:$0xff] }
 0xe1b   :  { %v1199_v51 = vpop.f32.mrf.mxu1 }
 0xe1c   :  { %736 = vrot.lane.b32.xlu0 %v723_v50, %s1331_s27  ;;  %v728_v55 = vadd.f32 %v723_v50, %v1492_v52 }
 0xe1d   :  { %v725_v53 = vpop.f32.mrf.mxu1 }
 0xe1e   :  { %v1083_v56 = vmul.f32 -1.442695, %v728_v55 }
 0xe1f   :  { %v1200_v54 = vpop.f32.mrf.mxu1 }
 0xe20   :  { %1280 = vpow2.f32 %v1083_v56 }
 0xe2d   :  { %v1281_v8 = vpop.eup %1280 }
 0xe2e   :  { %v732_v57 = vadd.f32 1.0, %v1281_v8 }
 0xe30   :  { %1282 = vrcp.f32 %v732_v57 }
 0xe3d   :  { %v1283_v58 = vpop.eup %1282 }
 0xe3e   :  { %v746_v25 = vsub.f32 1.0, %v1283_v58  ;;  %v752_v0 = vmul.f32 %v1283_v58, %v680_v46  ;;  %v902_v46 = vld [vmem:[%s1625_s7 + $0x10] sm:$0xff] }
 0xe8e   :  { %v737_v59 = vpop.permute.xlu0 %736 }
 0xe8f   :  { %v739_v60 = vmul.f32 %v1283_v58, %v737_v59 }
 0xe91   :  { %741 = vrot.lane.b32.xlu1 %v739_v60, %s1331_s27 }
 0xf03   :  { %v742_v14 = vpop.permute.xlu1 %741 }
 0xf04   :  { %v744_v61 = vadd.f32 %v742_v14, %v1492_v52 }
 0xf06   :  { %1284 = vtanh.f32 %v744_v61 }
 0xf13   :  { %v1285_v62 = vpop.eup %1284 }
 0xf14   :  { %748 = vrot.lane.b32.xlu0 %v1285_v62, %s1332_s6 }
 0xf86   :  { %v749_v63 = vpop.permute.xlu0 %748 }
 0xf87   :  { %v751_v1 = vmul.f32 %v749_v63, %v746_v25 }
 0xf89   :  { %v753_v2 = vadd.f32 %v752_v0, %v751_v1 }
 0xf8b   :  { %v754_v3 = vpack.c.bf16 %v753_v2, %v753_v2 }
 0xf8d   :  { %756 = vrot.lane.b32.xlu1 %v754_v3, %s1332_s6  ;;  %v994_v3 = vld [vmem:[%s1627_s9] sm:$0xff]  ;;  %s1333_s9 = smov [#allocation2]  }
 0xfff   :  { %v757_v4 = vpop.permute.xlu1 %756 }
0x1000   :  { %1206 = vmatmul.mubr.msk.bf16.vlgmr.msra.gmra.mxu0 %vm319_vm5, %v757_v4 }
0x1001   :  { %1225 = vmatprep.mubr.msk.f32.mxu0 %vm1330_vm4, %v1328_v7  ;;  %1218 = vmatpush3.msra.mxu0 %v903_v44 }
0x1002   :  { %1219 = vmatprep.subr.mxu0 %v1328_v7 }
0x1003   :  { %1220 = vmatpush3.msra.mxu0 %v902_v46 }
0x1004   :  { %1221 = vmatprep.subr.mxu0 %v1328_v7 }
0x1005   :  { %1222 = vmatpush3.msra.mxu0 %v901_v47 }
0x1006   :  { %1223 = vmatprep.subr.mxu0 %v1328_v7  ;;  %v1088_v7 = vld [vmem:[%s1626_s8] ss:$0 sm:$0xff] }
0x10c0   :  { %v795_v5 = vpop.f32.mrf.mxu0 }
0x10c1   :  { %v796_v52 = vadd.f32 %v1482_v38, %v795_v5 }
0x10c2   :  { %v1207_v6 = vpop.f32.mrf.mxu0 }
0x10c3   :  { %809 = vrot.lane.b32.xlu0 %v796_v52, %s1331_s27  ;;  %v801_v11 = vadd.f32 %v796_v52, %v1484_v40 }
0x10c4   :  { %v798_v9 = vpop.f32.mrf.mxu0 }
0x10c5   :  { %v1085_v12 = vmul.f32 -1.442695, %v801_v11 }
0x10c6   :  { %v1208_v10 = vpop.f32.mrf.mxu0 }
0x10c7   :  { %1286 = vpow2.f32 %v1085_v12 }
0x10d4   :  { %v1287_v13 = vpop.eup %1286 }
0x10d5   :  { %v805_v15 = vadd.f32 1.0, %v1287_v13 }
0x10d7   :  { %1288 = vrcp.f32 %v805_v15 }
0x10e4   :  { %v1289_v16 = vpop.eup %1288 }
0x10e5   :  { %v819_v22 = vsub.f32 1.0, %v1289_v16  ;;  %v825_v23 = vmul.f32 %v1289_v16, %v753_v2 }
0x1135   :  { %v810_v17 = vpop.permute.xlu0 %809 }
0x1136   :  { %v812_v18 = vmul.f32 %v1289_v16, %v810_v17 }
0x1138   :  { %814 = vrot.lane.b32.xlu1 %v812_v18, %s1331_s27 }
0x11aa   :  { %v815_v19 = vpop.permute.xlu1 %814 }
0x11ab   :  { %v817_v20 = vadd.f32 %v815_v19, %v1484_v40 }
0x11ad   :  { %1290 = vtanh.f32 %v817_v20 }
0x11ba   :  { %v1291_v21 = vpop.eup %1290 }
0x11bb   :  { %821 = vrot.lane.b32.xlu0 %v1291_v21, %s1332_s6 }
0x122d   :  { %v822_v31 = vpop.permute.xlu0 %821 }
0x122e   :  { %v824_v24 = vmul.f32 %v822_v31, %v819_v22 }
0x1230   :  { %v826_v26 = vadd.f32 %v825_v23, %v824_v24 }
0x1232   :  { %v827_v27 = vpack.c.bf16 %v826_v26, %v826_v26 }
0x1234   :  { %829 = vrot.lane.b32.xlu1 %v827_v27, %s1332_s6 }
0x12a6   :  { %v830_v28 = vpop.permute.xlu1 %829 }
0x12a7   :  { %1214 = vmatmul.mubr.msk.bf16.vlgmr.msra.gmra.mxu1 %vm319_vm5, %v830_v28 }
0x1367   :  { %v868_v29 = vpop.f32.mrf.mxu1 }
0x1368   :  { %v869_v30 = vadd.f32 %v1482_v38, %v868_v29 }
0x1369   :  { %v1215_v32 = vpop.f32.mrf.mxu1 }
0x136a   :  { %882 = vrot.lane.b32.xlu0 %v869_v30, %s1331_s27  ;;  %v874_v34 = vadd.f32 %v869_v30, %v1490_v49 }
0x136b   :  { %v871_v40 = vpop.f32.mrf.mxu1 }
0x136c   :  { %v1087_v36 = vmul.f32 -1.442695, %v874_v34 }
0x136d   :  { %v1216_v33 = vpop.f32.mrf.mxu1 }
0x136e   :  { %1292 = vpow2.f32 %v1087_v36 }
0x137b   :  { %v1293_v35 = vpop.eup %1292 }
0x137c   :  { %v878_v37 = vadd.f32 1.0, %v1293_v35 }
0x137e   :  { %1294 = vrcp.f32 %v878_v37 }
0x138b   :  { %v1295_v39 = vpop.eup %1294 }
0x138c   :  { %v892_v50 = vsub.f32 1.0, %v1295_v39  ;;  %v898_v53 = vmul.f32 %v1295_v39, %v826_v26 }
0x13dc   :  { %v883_v41 = vpop.permute.xlu0 %882 }
0x13dd   :  { %v885_v42 = vmul.f32 %v1295_v39, %v883_v41 }
0x13df   :  { %887 = vrot.lane.b32.xlu1 %v885_v42, %s1331_s27 }
0x1451   :  { %v888_v43 = vpop.permute.xlu1 %887 }
0x1452   :  { %v890_v38 = vadd.f32 %v888_v43, %v1490_v49  ;;  %v900_v49 = vld [vmem:[%s1625_s7] sm:$0xff] }
0x1453   :  { %1224 = vmatpush3.msra.mxu0 %v900_v49 }
0x1454   :  { %1296 = vtanh.f32 %v890_v38 }
0x1461   :  { %v1297_v48 = vpop.eup %1296 }
0x1462   :  { %894 = vrot.lane.b32.xlu0 %v1297_v48, %s1332_s6 }
0x1466   :  { %1015 = vperm.xlu0 %1236, %v1012_v45  }
0x14d4   :  { %v895_v51 = vpop.permute.xlu0 %894 }
0x14d5   :  { %v897_v54 = vmul.f32 %v895_v51, %v892_v50 }
0x14d7   :  { %v899_v55 = vadd.f32 %v898_v53, %v897_v54 }
0x14d9   :  { %912 = vrot.lane.b32.xlu1 %v899_v55, %s1332_s6 }
0x14e1   :  { %v1016_v15 = vpop.permute.xlu0 %1015 }
0x154b   :  { %v913_v56 = vpop.permute.xlu1 %912 }
0x154c   :  { %1226 = vmatmul.mubr.msk.f32.vlgmr.msra.gmra.mxu0 %vm319_vm5, %v913_v56 }
0x160c   :  { %v982_v8 = vpop.f32.mrf.mxu0 }
0x160d   :  { %v983_v57 = vadd.f32 %v1088_v7, %v982_v8 }
0x160e   :  { %v1227_v58 = vpop.f32.mrf.mxu0 }
0x160f   :  { %v1090_v59 = vmul.f32 -1.442695, %v983_v57 }
0x1611   :  { %1298 = vpow2.f32 %v1090_v59 }
0x161e   :  { %v1299_v60 = vpop.eup %1298 }
0x161f   :  { %v989_v14 = vadd.f32 1.0, %v1299_v60 }
0x1621   :  { %1300 = vrcp.f32 %v989_v14 }
0x162e   :  { %v1301_v61 = vpop.eup %1300 }
0x162f   :  { %v998_v62 = vand.u32 2147483647, %v1301_v61  ;;  %993 = vst.msk [vmem:[%s1629_s11] sm:$0xff] %vm992_vm6, %v1301_v61  ;;  %v995_v5 = vmax.f32 %v1301_v61, 0.0  ;;  %v996_v52 = vmul.f32 %v1301_v61, %v994_v3  ;;  %s1040_s11 = sshll.u32 %s1333_s9, 4  ;;  %s1041_s11 = int_to_ptr.vmem [resolvable:$true] %s1040_s11 }
0x1630   :  { %s1306_s21 = scalar_lea.vmem %s1041_s11, 16  ;;  %s1310_s22 = scalar_lea.vmem %s1041_s11, 32 }
0x1631   :  { %v999_v25 = vsub.f32 0.0, %v998_v62  ;;  %v997_v12 = vsub.f32 %v995_v5, %v996_v52  ;;  %p1307_p0 = scmp.ne.s32.totalorder %s1041_s11, %s1306_s21  ;;  %p1311_p1 = scmp.lt.s32.totalorder %s1041_s11, %s1041_s11 }
0x1632   :  { %p1312_p2 = scmp.lt.s32.totalorder %s1310_s22, %s1306_s21 }
0x1633   :  { %v1000_v63 = vmul.f32 1.442695, %v999_v25 }
0x1634   :  { %p1313_p3 = por %p1312_p2, %p1311_p1 }
0x1635   :  { %1302 = vpow2.f32 %v1000_v63 }
0x1636   :  { %p1314_p4 = pnand %p1313_p3, %p1307_p0 }
0x1642   :  { %v1303_v0 = vpop.eup %1302 }
0x1643   :  { %v1002_v1 = vadd.f32 1.0, %v1303_v0  ;;  %v1005_v2 = vmul.f32 -0.5, %v1303_v0  ;;  %v1008_v6 = vand.u32 2147483647, %v1303_v0 }
0x1645   :  { %1304 = vlog2.f32 %v1002_v1  ;;  %v1006_v4 = vadd.f32 1.0, %v1005_v2  ;;  %vm1009_vm7 = vcmp.lt.f32.partialorder %v1008_v6, 0.0004427343 }
0x1647   :  { %v1007_v11 = vmul.f32 %v1303_v0, %v1006_v4 }
0x1652   :  { %v1305_v9 = vpop.eup %1304 }
0x1653   :  { %v1004_v10 = vmul.f32 0.6931472, %v1305_v9 }
0x1655   :  { %v1010_v13 = vsel %vm1009_vm7, %v1007_v11, %v1004_v10 }
0x1656   :  { %v1011_v16 = vadd.f32 %v1010_v13, %v997_v12 }
0x1658   :  { %v1018_v17 = vmul.f32 %v1016_v15, %v1011_v16 }
0x165a   :  { %v1019_v18 = vsel %vm992_vm6, %v1018_v17, 0.0 }
0x165b   :  { %v1020_v19 = vrot.slane %v1019_v18, 4 }
0x165d   :  { %v1021_v20 = vadd.f32 %v1020_v19, %v1019_v18 }
0x165f   :  { %v1022_v21 = vrot.slane %v1021_v20, 2 }
0x1661   :  { %v1023_v22 = vadd.f32 %v1022_v21, %v1021_v20 }
0x1663   :  { %v1024_v31 = vrot.slane %v1023_v22, 1 }
0x1665   :  { %v1025_v23 = vadd.f32 %v1024_v31, %v1023_v22 }
0x1667   :  { %v1026_v24 = vsel %vm992_vm6, %v1025_v23, 0.0 }
0x1668   :  { %1027 = vadd.xlane.f32.xlu1 %v1026_v24 }
0x16f1   :  { %v1028_v26 = vpop.xlane.xlu1 %1027 }
0x16f2   :  { %v1029_v27 = vmul.f32 0.015625, %v1028_v26 }
0x16f4   :  { %1031 = vst.msk [vmem:[#allocation2] sm:$0x1] %vm1030_vm8, %v1029_v27 }
0x16f5   :  { %1317 = shalt.err (!%p1314_p4)
}
0x16f6   :  { %1043 = dma.vmem_to_hbm [thread:$0]  %s1041_s11, 16, %s1630_s12, [#allocation3]  }
0x16f7   :  { %1326 = dma.done.wait [#allocation3], 16  }
0x16f8   :  { %1327 = vsyncadd [#allocation3], 4294967280 }
0x16f9   :  { %1049 = vsyncpa [#allocation3], 1 }

</bundles_post_ra>
